<compile_context>
chip_gen: v7x
topology: tpu7x:2x2x1
jax: 0.10.0
libtpu: 0.0.40
codegen_flags: <defaults>
</compile_context>

<pallas_src>
import jax
import jax.numpy as jnp
from jax.experimental import pallas as pl
from jax.experimental.pallas import tpu as pltpu

_LANES = 128


def _make_shifted_exp_kernel(scale, shift):
    def kernel(x_ref, o_ref):
        y = jnp.exp(x_ref[...])
        if scale != 1:
            y = y * scale
        if shift != 0:
            y = y + shift
        o_ref[...] = y.astype(o_ref.dtype)

    return kernel


def shifted_exponential_activation(
    x: jax.Array,
    *,
    shift: float = 0.0,
    scale: float = 1.0,
    target_block_bytes: int = 2 * 1024 * 1024,
) -> jax.Array:
    """y = exp(x) * scale + shift, elementwise, via a Pallas TPU kernel."""
    orig_shape = x.shape
    dtype = x.dtype
    n = x.size
    itemsize = jnp.dtype(dtype).itemsize
    # Native sublane packing: 8 rows for 4-byte, 16 for 2-byte, 32 for 1-byte.
    sub = max(8, 32 // itemsize)

    x_flat = x.reshape(-1)
    pad = (-n) % _LANES
    if pad:
        # TODO(synk): rare tail-pad path copies the flat array (extra HBM pass);
        # a masked tail kernel would avoid it. Only hit when n % 128 != 0.
        x_flat = jnp.pad(x_flat, (0, pad))
    rows = x_flat.size // _LANES
    x2d = x_flat.reshape(rows, _LANES)

    def _round_up(v, m):
        return ((v + m - 1) // m) * m

    # Large dtype-aware row tile targeting ~target_block_bytes per block.
    tr = max(sub, (target_block_bytes // (_LANES * itemsize)) // sub * sub)
    tr = min(tr, _round_up(rows, sub))
    # Keep at least 2 grid steps when possible (v7x megacore sharding).
    if rows > sub and pl.cdiv(rows, tr) < 2:
        tr = _round_up(pl.cdiv(rows, 2), sub)
    grid = (pl.cdiv(rows, tr),)

    out2d = pl.pallas_call(
        _make_shifted_exp_kernel(scale, shift),
        out_shape=jax.ShapeDtypeStruct((rows, _LANES), dtype),
        grid_spec=pltpu.PrefetchScalarGridSpec(
            num_scalar_prefetch=0,
            grid=grid,
            in_specs=[pl.BlockSpec((tr, _LANES), lambda i: (i, 0))],
            out_specs=pl.BlockSpec((tr, _LANES), lambda i: (i, 0)),
        ),
        compiler_params=pltpu.CompilerParams(
            dimension_semantics=("parallel",),
        ),
    )(x2d)

    out_flat = out2d.reshape(-1)
    if pad:
        out_flat = out_flat[:n]
    return out_flat.reshape(orig_shape)


if __name__ == "__main__":
    key = jax.random.PRNGKey(0)
    # NCHW input, small shape: batch=2, channels=4, spatial=16x16
    x = jax.random.normal(key, (2, 4, 16, 16), dtype=jnp.float32)

    # Default module parameters (shift=0, scale=1): plain exp.
    y = shifted_exponential_activation(x)
    y = jax.block_until_ready(y)
    ref = jnp.exp(x)
    assert y.shape == x.shape and y.dtype == x.dtype
    assert jnp.allclose(y, ref, rtol=1e-6, atol=1e-6)

    # Non-default scale/shift exercise the fused scale+shift path.
    y2 = shifted_exponential_activation(x, shift=0.5, scale=2.0)
    y2 = jax.block_until_ready(y2)
    ref2 = jnp.exp(x) * 2.0 + 0.5
    assert jnp.allclose(y2, ref2, rtol=1e-6, atol=1e-6)

    print("KERNEL_OK")
</pallas_src>

<mosaic_0001>
module attributes {stable_mosaic.version = 11 : i64} {
  func.func @kernel(%arg0: i32, %arg1: memref<8x128xf32, #tpu.memory_space<vmem>>, %arg2: memref<8x128xf32, #tpu.memory_space<vmem>>) attributes {dimension_semantics = [#tpu.dimension_semantics<parallel>], iteration_bounds = array<i64: 2>, scalar_prefetch = 0 : i64, scratch_operands = 0 : i64, tpu.core_type = #tpu.core_type<tc>, window_params = [{transform_indices = @transform_0, window_bounds = array<i64: 8, 128>}, {transform_indices = @transform_1, window_bounds = array<i64: 8, 128>}]} {
    %c0 = arith.constant 0 : index
    %c0_0 = arith.constant 0 : index
    %0 = vector.load %arg1[%c0, %c0_0] : memref<8x128xf32, #tpu.memory_space<vmem>>, vector<8x128xf32>
    %1 = math.exp %0 : vector<8x128xf32>
    %c0_1 = arith.constant 0 : index
    %c0_2 = arith.constant 0 : index
    %2 = vector.load %arg2[%c0_1, %c0_2] : memref<8x128xf32, #tpu.memory_space<vmem>>, vector<8x128xf32>
    tpu.vector_store %arg2[%c0_1, %c0_2], %1 {strides = array<i32>} : memref<8x128xf32, #tpu.memory_space<vmem>>, vector<8x128xf32>,
    return
  }
  func.func @transform_0(%arg0: i32) -> (i32, i32) {
    %c0_i32 = arith.constant 0 : i32
    %c0_i32_0 = arith.constant 0 : i32
    return %arg0, %c0_i32 : i32, i32
  }
  func.func @transform_1(%arg0: i32) -> (i32, i32) {
    %c0_i32 = arith.constant 0 : i32
    %c0_i32_0 = arith.constant 0 : i32
    return %arg0, %c0_i32 : i32, i32
  }
}

</mosaic_0001>

<bundles_post_ra>
// kernel: tpu_custom_call.1
= control target key start
LH: loop header
LB: loop body
LE: loop exit
PB: predicated region body
PF: predicated region fallthrough
CT: control target
= control target key end

     0   :  { %6 = vsyncpa [#allocation3], 0  ;;  %s551_s0 = inlined_call_operand.hbm [shape: f32[16,128], index: 0, kind: input, shape index: {}]   ;;  %s552_s1 = inlined_call_operand.hbm [shape: f32[16,128], index: 1, kind: output, shape index: {}]  }
   0x1   :  { %8 = vsyncpa [#allocation3 + $0x1], 0 }
   0x2   :  { %9 = vsyncpa [#allocation4], 0 }
   0x3   :  { %11 = vsyncpa [#allocation4 + $0x1], 0  ;;  %s390_s6 = smov 0   ;;  %s392_s7 = smov 0  }
   0x4   :  { %s394_s8 = smov 0   ;;  %s396_s9 = smov 0  }
   0x5 LB: > { %s411_s10 = sadd.s32 4294967295, %s376_s9   ;;  %s220_s11 = sadd.s32 4294967294, %s376_s9   ;;  %s376_s9 = sphi %s396_s9, %s567_s9   ;;  %s372_s8 = sphi %s394_s8, %s566_s8   ;;  %s368_s7 = sphi %s392_s7, %s565_s7   ;;  %s364_s6 = sphi %s390_s6, %s564_s6  }
   0x6   : > { %s415_s12 = sadd.s32 1, %s376_s9   ;;  %s24_s13 = sadd.s32 1, %s372_s8 }
   0x7   : > { %s21_s14 = ssub.s32 %s376_s9, %s415_s12  ;;  %p31_p0 = scmp.ne.s32.totalorder %s372_s8, %s368_s7 }
   0x8   : > { %p22_p1 = scmp.eq.s32.totalorder %s21_s14, 0  ;;  %p32_p2 = scmp.eq.s32.totalorder %s376_s9, 0 }
   0x9   : > { %p37_p3 = scmp.ne.s32.totalorder %s368_s7, %s364_s6  ;;  %p38_p4 = scmp.eq.s32.totalorder %s411_s10, 0 }
   0xa   : > { %s427_s15 = scalar_select %p22_p1, %s372_s8, %s24_s13  }
   0xb   : > { %p429_p5 = por %p32_p2, %p31_p0  ;;  %p433_p6 = por %p38_p4, %p37_p3 }
   0xc   : > { %p61_p7 = scmp.eq.s32.totalorder %s411_s10, 1  ;;  %p67_p8 = scmp.eq.s32.totalorder %s220_s11, 1 }
   0xd   : > { %p244_p10 = scmp.lt.s32.totalorder %s376_s9, 2  ;;  %s87_s20 = sand.u32 1, %s372_s8  }
   0xe   : > { %p440_p11 = por %p61_p7, %p31_p0  ;;  %p444_p12 = por %p67_p8, %p37_p3 }
   0xf   : > { %s224_s21 = sshll.u32 %s376_s9, 7  ;;  %s223_s22 = sshll.u32 %s87_s20, 3 }
  0x10   : > { %s556_s18 = scalar_select %p440_p11, 1, 0 }
  0x11   : > { %s557_s19 = scalar_select %p444_p12, 1, 0 }
  0x12   : > { %s453_s25 = scalar_lea.hbm %s551_s0, %s224_s21  ;;  %s91_s26 = scalar_lea.vmem [#allocation2], %s223_s22 }
  0x13   : > { %s98_s27 = sshll.u32 %s91_s26, 4  ;;  %p457_p13 = pnand %p244_p10, %p429_p5  ;;  %s461_s27 = int_to_ptr.vmem [resolvable:$true] %s98_s27 }
  0x14   : > { %s88_s29 = scalar_lea.sflag [#allocation3], %s87_s20  ;;  %s280_s30 = scalar_lea.hbm %s453_s25, 128 }
  0x15   : > { %p281_p2 = scmp.ne.s32.totalorder %s453_s25, %s280_s30  ;;  %p282_p3 = pneg %p457_p13 }
  0x16   : > { %s285_s4 = scalar_lea.hbm %s551_s0, 256  ;;  %p286_p5 = scmp.lt.u32.totalorder %s453_s25, %s551_s0 }
  0x17   : > { %p283_p4 = pnand %p282_p3, %p281_p2  ;;  %p287_p8 = scmp.lt.u32.totalorder %s285_s4, %s280_s30 }
  0x18   : > { %p289_p9 = scmp.lt.u32.totalorder %s280_s30, %s453_s25 }
  0x19   : > { %p284_p7 = pneg %p283_p4  ;;  %p288_p10 = por %p287_p8, %p286_p5 }
  0x1b   : > { %p290_p0 = por %p289_p9, %p288_p10 }
  0x1d   : > { %p291_p1 = pnand %p290_p0, %p284_p7 }
  0x1f   : > { %294 = shalt.err (!%p291_p1)
}
  0x20   : > { %s295_s13 = scalar_lea.vmem %s461_s27, 128  ;;  %s378_s14 = smov [#allocation2]  }
  0x21   : > { %p296_p2 = scmp.ne.s32.totalorder %s461_s27, %s295_s13  ;;  %s300_s16 = sshll.u32 %s378_s14, 4  ;;  %s301_s16 = int_to_ptr.vmem [resolvable:$false] %s300_s16 }
  0x22   : > { %s302_s20 = scalar_lea.vmem %s301_s16, 256  ;;  %p303_p11 = scmp.lt.s32.totalorder %s461_s27, %s301_s16 }
  0x23   : > { %p298_p4 = pnand %p296_p2, %p282_p3  ;;  %p304_p5 = scmp.lt.s32.totalorder %s302_s20, %s295_s13 }
  0x25   : > { %p299_p12 = pneg %p298_p4  ;;  %p305_p8 = por %p304_p5, %p303_p11 }
  0x27   : > { %p306_p9 = pnand %p305_p8, %p299_p12 }
  0x29   : > { %309 = shalt.err (!%p306_p9)
}
  0x2a   : > { %239 = dma.hbm_to_vmem [thread:$0]  (!%p457_p13), %s453_s25, 128, %s461_s27, %s88_s29  }
  0x2b   : > { %p559_p0 = scmp.lt.s32.totalorder %s376_s9, 3  ;;  %p560_p1 = scmp.ge.s32.totalorder %s376_s9, 1 }
  0x2d   : > { %p104_p3 = pnand %p560_p1, %p559_p0 }
  0x2e   : > { %s495_s21 = sand.u32 (!%p104_p3), 1, %s368_s7  }
  0x2f   : > { %107 = sbr.rel (%p104_p3) target bundleno = 83 (0x53), region = 24  ;;  %s226_s22 = sshll.u32 (!%p104_p3), %s495_s21, 3 }
  0x30   : > { %s110_s23 = scalar_lea.sflag (!%p104_p3), [#allocation3], %s495_s21  ;;  %s113_s24 = scalar_lea.vmem (!%p104_p3), [#allocation2], %s226_s22 }
  0x36   : > { %355 = dma.done.wait (%p433_p6), %s110_s23, 128  }
  0x37   : > { %357 = vsyncadd (%p433_p6), %s110_s23, 4294967168  ;;  %v132_v0 = vld [vmem:[%s113_s24] sm:$0xff]  ;;  %s131_s25 = scalar_lea.vmem [#allocation5], %s226_s22  ;;  %s229_s27 = sshll.u32 %s411_s10, 7 }
  0x38   : > { %v133_v1 = vmul.f32 1.442695, %v132_v0  ;;  %s150_s26 = sshll.u32 %s131_s25, 4  ;;  %s509_s30 = scalar_lea.hbm %s552_s1, %s229_s27  ;;  %s504_s26 = int_to_ptr.vmem [resolvable:$true] %s150_s26 }
  0x39   : > { %s137_s17 = scalar_lea.sflag [#allocation4], %s495_s21  ;;  %s310_s2 = scalar_lea.vmem %s504_s26, 128 }
  0x3a   : > { %278 = vpow2.f32 %v133_v1  ;;  %p311_p6 = scmp.ne.s32.totalorder %s504_s26, %s310_s2  ;;  %p561_p11 = scmp.ne.s32.totalorder %s556_s18, 0 }
  0x3b   : > { %s379_s3 = smov [#allocation5]  }
  0x3c   : > { %p312_p12 = pnand %p311_p6, %p561_p11  ;;  %s314_s10 = sshll.u32 %s379_s3, 4  ;;  %s315_s10 = int_to_ptr.vmem [resolvable:$false] %s314_s10 }
  0x3d   : > { %s316_s4 = scalar_lea.vmem %s315_s10, 256  ;;  %p317_p7 = scmp.lt.s32.totalorder %s504_s26, %s315_s10 }
  0x3e   : > { %p313_p13 = pneg %p312_p12  ;;  %p318_p10 = scmp.lt.s32.totalorder %s316_s4, %s310_s2 }
  0x40   : > { %p319_p2 = por %p318_p10, %p317_p7 }
  0x42   : > { %p320_p4 = pnand %p319_p2, %p313_p13 }
  0x44   : > { %v279_v2 = vpop.eup %278 }
  0x45   : > { %135 = vst [vmem:[%s131_s25] sm:$0xff] %v279_v2 }
  0x46   : > { %323 = shalt.err (!%p320_p4)
}
  0x47   : > { %s324_s5 = scalar_lea.hbm %s509_s30, 128  ;;  %s328_s14 = scalar_lea.hbm %s552_s1, 256 }
  0x48   : > { %p325_p5 = scmp.ne.s32.totalorder %s509_s30, %s324_s5  ;;  %p329_p0 = scmp.lt.u32.totalorder %s509_s30, %s552_s1 }
  0x49   : > { %p330_p1 = scmp.lt.u32.totalorder %s328_s14, %s324_s5  ;;  %p332_p6 = scmp.lt.u32.totalorder %s324_s5, %s509_s30 }
  0x4a   : > { %p326_p8 = pnand %p325_p5, %p561_p11 }
  0x4b   : > { %p331_p3 = por %p330_p1, %p329_p0 }
  0x4c   : > { %p327_p9 = pneg %p326_p8 }
  0x4d   : > { %p333_p12 = por %p332_p6, %p331_p3 }
  0x4f   : > { %p334_p13 = pnand %p333_p12, %p327_p9 }
  0x51   : > { %337 = shalt.err (!%p334_p13)
}
  0x52   : > { %234 = dma.vmem_to_hbm [thread:$0]  (%p561_p11), %s504_s26, 128, %s509_s30, %s137_s17  }
  0x53 PF: > { %s162_s21 = sand.u32 1, %s364_s6   ;;  %p562_p7 = scmp.ne.s32.totalorder %s557_s19, 0 }
  0x54   : > { %p563_p10 = scmp.ge.s32.totalorder %s376_s9, 2  ;;  %s163_s22 = scalar_lea.sflag [#allocation4], %s162_s21 }
  0x56   : > { %p241_p2 = pnand %p563_p10, %p562_p7 }
  0x58   : > { %359 = dma.done.wait (!%p241_p2), %s163_s22, 128  }
  0x59   : > { %361 = vsyncadd (!%p241_p2), %s163_s22, 4294967168  ;;  %p14_p4 = scmp.ge.s32.totalorder %s415_s12, 4   ;;  %s564_s6 = smov %s368_s7 }
  0x5a   : > { %s565_s7 = smov %s372_s8  ;;  %s566_s8 = smov %s427_s15 }
  0x5b   : > { %s567_s9 = smov %s415_s12  ;;  %16 = sbr.rel (!%p14_p4) target bundleno = 5 (0x5), region = 69 }
  0x62   :  { %168 = vsyncpa [#allocation3], 1 }
  0x63   :  { %170 = vsyncpa [#allocation3 + $0x1], 1 }
  0x64   :  { %171 = vsyncpa [#allocation4], 1 }
  0x65   :  { %173 = vsyncpa [#allocation4 + $0x1], 1 }

</bundles_post_ra>
